<compile_context>
chip_gen: v7x
topology: tpu7x:2x2x1
jax: 0.10.0
libtpu: 0.0.40
codegen_flags: <defaults>
</compile_context>

<pallas_src>
import jax
import jax.numpy as jnp
from jax.experimental import pallas as pl
from jax.experimental.pallas import tpu as pltpu


def _fused_pointwise_kernel(x_ref, w_ref, b_ref, o_ref):
    # x_ref: (C, TS)    one batch's tile: channels on sublanes, spatial on lanes
    # w_ref: (Cout, C)  fused weight (bf16 by default)
    # b_ref: (Cout, 1)  fused bias (f32)
    # o_ref: (Cout, TS) lane-dense output tile
    x = x_ref[...]
    if x.dtype != w_ref.dtype:
        x = x.astype(w_ref.dtype)   # cast in VMEM (VPU); avoids an HBM cast pass
    acc = jnp.dot(w_ref[...], x, preferred_element_type=jnp.float32)
    o_ref[...] = (acc + b_ref[...]).astype(o_ref.dtype)


def _largest_tile(total, cap):
    """Largest multiple of 128 dividing `total` (itself a 128-multiple), <= cap."""
    t = min(cap, total)
    t -= t % 128
    while t >= 128:
        if total % t == 0:
            return t
        t -= 128
    return 128


def up_forward(x_nchw, w1, b1, w2, b2, is_shift=True, *,
               ts_target=1024, compute_dtype=jnp.bfloat16, out_dtype=None):
    """Pallas implementation of Up.forward.

    x_nchw: (B, C, H, W);  w1: (C, C, 1, 1), b1: (C,);  w2: (C//2, C, 1, 1), b2: (C//2,)
    returns (B, C//2, 2H, 2W)
    """
    del is_shift  # ShiftConv2d shift amount is (0, 0) for 1x1 kernels -> exact no-op
    B, C, H, W = x_nchw.shape
    Cout = w2.shape[0]
    HW = H * W
    out_dtype = x_nchw.dtype if out_dtype is None else out_dtype

    # ---- fold conv2 . conv1 into a single affine map (exact composition, f32) ----
    w1m = w1[:, :, 0, 0].astype(jnp.float32)                      # (C, C)
    w2m = w2[:, :, 0, 0].astype(jnp.float32)                      # (Cout, C)
    wf = jnp.dot(w2m, w1m, preferred_element_type=jnp.float32)    # (Cout, C)
    bf = (jnp.dot(w2m, b1.astype(jnp.float32),
                  preferred_element_type=jnp.float32)
          + b2.astype(jnp.float32)).reshape(Cout, 1)              # (Cout, 1)
    if compute_dtype is not None:
        wf = wf.astype(compute_dtype)   # tiny; activation tile is cast in-kernel

    # ---- NCHW with spatial flattened onto the lane axis (pad to 128-multiple) ----
    xm = x_nchw.reshape(B, C, HW)
    HWp = -(-HW // 128) * 128
    if HWp != HW:
        xm = jnp.pad(xm, ((0, 0), (0, 0), (0, HWp - HW)))

    x_bytes = jnp.dtype(xm.dtype).itemsize
    w_bytes = jnp.dtype(wf.dtype).itemsize
    o_bytes = jnp.dtype(out_dtype).itemsize

    def vmem_need(t):
        return (2 * t * C * x_bytes            # double-buffered input tile
                + 2 * t * Cout * o_bytes       # double-buffered output tile
                + C * Cout * w_bytes + Cout * 4  # grid-invariant weight / bias
                + (1 << 20))                   # headroom

    ts = _largest_tile(HWp, min(ts_target, HWp))
    while B * (HWp // ts) < 4 and ts > 128:    # feed both v7x TensorCores
        ts = _largest_tile(HWp, ts // 2)
    while vmem_need(ts) > (40 << 20) and ts > 128:   # stay well under 64 MiB (v7x)
        ts = _largest_tile(HWp, ts // 2)
    grid = (B, HWp // ts)

    need = vmem_need(ts)
    vmem_limit = None
    if need > (12 << 20):                      # only raise when actually required
        vmem_limit = min(max(2 * need, 32 << 20), 48 << 20)

    cost = pl.CostEstimate(
        flops=2 * B * HWp * C * Cout,
        transcendentals=0,
        bytes_accessed=int(B * HWp * C * x_bytes + B * HWp * Cout * o_bytes
                           + C * Cout * w_bytes + Cout * 4),
    )

    out = pl.pallas_call(
        _fused_pointwise_kernel,
        out_shape=jax.ShapeDtypeStruct((B, Cout, HWp), out_dtype),
        grid_spec=pltpu.PrefetchScalarGridSpec(
            num_scalar_prefetch=0,
            grid=grid,
            in_specs=[
                pl.BlockSpec((None, C, ts), lambda b, s: (b, 0, s)),
                pl.BlockSpec((Cout, C), lambda b, s: (0, 0)),   # grid-invariant weight
                pl.BlockSpec((Cout, 1), lambda b, s: (0, 0)),   # grid-invariant bias
            ],
            out_specs=pl.BlockSpec((None, Cout, ts), lambda b, s: (b, 0, s)),
        ),
        compiler_params=pltpu.CompilerParams(
            dimension_semantics=("parallel", "parallel"),
            vmem_limit_bytes=vmem_limit),
        cost_estimate=cost,
    )(xm, wf, bf)

    # ---- drop padding, then 2x nearest replication as ONE broadcast (free reshape) --
    y = out[:, :, :HW] if HWp != HW else out
    y = y.reshape(B, Cout, H, 1, W, 1)
    y = jnp.broadcast_to(y, (B, Cout, H, 2, W, 2))
    return y.reshape(B, Cout, 2 * H, 2 * W)


def _reference_forward(x_nchw, w1, b1, w2, b2):
    """Pure-JAX f32 reference mirroring the PyTorch module (upsample -> conv1 -> conv2)."""
    xu = jnp.repeat(jnp.repeat(x_nchw, 2, axis=2), 2, axis=3)
    h = jnp.einsum("bchw,oc->bohw", xu, w1[:, :, 0, 0]) + b1[None, :, None, None]
    o = jnp.einsum("bchw,oc->bohw", h, w2[:, :, 0, 0]) + b2[None, :, None, None]
    return o


def _reference_forward_bf16(x_nchw, w1, b1, w2, b2):
    """Reference matching the kernel's numerics (fused weight + activations rounded to
    bf16, f32 accumulation, f32 bias) for a tight correctness check."""
    w1m = w1[:, :, 0, 0].astype(jnp.float32)
    w2m = w2[:, :, 0, 0].astype(jnp.float32)
    wf = (w2m @ w1m).astype(jnp.bfloat16).astype(jnp.float32)
    bfv = w2m @ b1.astype(jnp.float32) + b2.astype(jnp.float32)
    xb = x_nchw.astype(jnp.bfloat16).astype(jnp.float32)
    y = jnp.einsum("bchw,oc->bohw", xb, wf) + bfv[None, :, None, None]
    return jnp.repeat(jnp.repeat(y, 2, axis=2), 2, axis=3)


if __name__ == "__main__":
    key = jax.random.PRNGKey(0)
    k_x, k_w1, k_b1, k_w2, k_b2 = jax.random.split(key, 5)

    B, chan, H, W = 2, 8, 16, 16
    x = jax.random.normal(k_x, (B, chan, H, W), dtype=jnp.float32)

    # Deterministic param init mimicking nn.Conv2d defaults (uniform +-1/sqrt(fan_in))
    bound = 1.0 / (chan ** 0.5)
    w1 = jax.random.uniform(k_w1, (chan, chan, 1, 1), jnp.float32, -bound, bound)
    b1 = jax.random.uniform(k_b1, (chan,), jnp.float32, -bound, bound)
    w2 = jax.random.uniform(k_w2, (chan // 2, chan, 1, 1), jnp.float32, -bound, bound)
    b2 = jax.random.uniform(k_b2, (chan // 2,), jnp.float32, -bound, bound)

    fwd = jax.jit(lambda *a: up_forward(*a))
    y = jax.block_until_ready(fwd(x, w1, b1, w2, b2))

    assert y.shape == (B, chan // 2, 2 * H, 2 * W), y.shape

    # tight check vs a reference with matching bf16 rounding
    y_tight = _reference_forward_bf16(x, w1, b1, w2, b2)
    assert jnp.allclose(y, y_tight, atol=1e-4, rtol=1e-4), "mismatch vs bf16-matched reference"

    # loose check vs the exact f32 PyTorch-equivalent reference (bf16 compute path)
    y_ref = _reference_forward(x, w1, b1, w2, b2)
    assert jnp.allclose(y, y_ref, atol=3e-2, rtol=5e-2), "mismatch vs f32 reference"

    print("KERNEL_OK")
</pallas_src>

<mosaic_0001>
module attributes {stable_mosaic.version = 11 : i64} {
  func.func @_fused_pointwise_kernel(%arg0: i32, %arg1: i32, %arg2: memref<1x8x128xf32, #tpu.memory_space<vmem>>, %arg3: memref<4x8xbf16, #tpu.memory_space<vmem>>, %arg4: memref<4x1xf32, #tpu.memory_space<vmem>>, %arg5: memref<1x4x128xf32, #tpu.memory_space<vmem>>) attributes {dimension_semantics = [#tpu.dimension_semantics<parallel>, #tpu.dimension_semantics<parallel>], iteration_bounds = array<i64: 2, 2>, scalar_prefetch = 0 : i64, scratch_operands = 0 : i64, tpu.core_type = #tpu.core_type<tc>, window_params = [{transform_indices = @transform_0, window_bounds = array<i64: 1, 8, 128>}, {pipeline_mode = #tpu.pipeline_mode<synchronous>, transform_indices = @transform_1, window_bounds = array<i64: 4, 8>}, {pipeline_mode = #tpu.pipeline_mode<synchronous>, transform_indices = @transform_2, window_bounds = array<i64: 4, 1>}, {transform_indices = @transform_3, window_bounds = array<i64: 1, 4, 128>}]} {
    %c0 = arith.constant 0 : index
    %c0_0 = arith.constant 0 : index
    %c0_1 = arith.constant 0 : index
    %0 = vector.load %arg2[%c0, %c0_0, %c0_1] : memref<1x8x128xf32, #tpu.memory_space<vmem>>, vector<1x8x128xf32>
    %1 = vector.shape_cast %0 : vector<1x8x128xf32> to vector<8x128xf32>
    %2 = arith.truncf %1 : vector<8x128xf32> to vector<8x128xbf16>
    %c0_2 = arith.constant 0 : index
    %c0_3 = arith.constant 0 : index
    %3 = vector.load %arg3[%c0_2, %c0_3] : memref<4x8xbf16, #tpu.memory_space<vmem>>, vector<4x8xbf16>
    %cst = arith.constant dense<0.000000e+00> : vector<4x128xf32>
    %4 = tpu.matmul %3, %2, %cst {dimension_numbers = #tpu.dot_dimension_numbers<[1], [0], [0], [1], [0, 0, 1, 1], [], []>} : vector<4x8xbf16>, vector<8x128xbf16>, vector<4x128xf32> -> vector<4x128xf32>
    %c0_4 = arith.constant 0 : index
    %c0_5 = arith.constant 0 : index
    %5 = vector.load %arg4[%c0_4, %c0_5] : memref<4x1xf32, #tpu.memory_space<vmem>>, vector<4x1xf32>
    %6 = vector.broadcast %5 : vector<4x1xf32> to vector<4x128xf32>
    %7 = arith.addf %4, %6 : vector<4x128xf32>
    %c0_6 = arith.constant 0 : index
    %c0_7 = arith.constant 0 : index
    %c0_8 = arith.constant 0 : index
    %8 = vector.load %arg5[%c0_6, %c0_7, %c0_8] : memref<1x4x128xf32, #tpu.memory_space<vmem>>, vector<1x4x128xf32>
    %9 = vector.shape_cast %8 : vector<1x4x128xf32> to vector<4x128xf32>
    %10 = vector.shape_cast %7 : vector<4x128xf32> to vector<1x4x128xf32>
    tpu.vector_store %arg5[%c0_6, %c0_7, %c0_8], %10 {strides = array<i32>} : memref<1x4x128xf32, #tpu.memory_space<vmem>>, vector<1x4x128xf32>,
    return
  }
  func.func @transform_0(%arg0: i32, %arg1: i32) -> (i32, i32, i32) {
    %c0_i32 = arith.constant 0 : i32
    %c0_i32_0 = arith.constant 0 : i32
    return %arg0, %c0_i32, %arg1 : i32, i32, i32
  }
  func.func @transform_1(%arg0: i32, %arg1: i32) -> (i32, i32) {
    %c0_i32 = arith.constant 0 : i32
    %c0_i32_0 = arith.constant 0 : i32
    %c0_i32_1 = arith.constant 0 : i32
    return %c0_i32, %c0_i32_0 : i32, i32
  }
  func.func @transform_2(%arg0: i32, %arg1: i32) -> (i32, i32) {
    %c0_i32 = arith.constant 0 : i32
    %c0_i32_0 = arith.constant 0 : i32
    %c0_i32_1 = arith.constant 0 : i32
    return %c0_i32, %c0_i32_0 : i32, i32
  }
  func.func @transform_3(%arg0: i32, %arg1: i32) -> (i32, i32, i32) {
    %c0_i32 = arith.constant 0 : i32
    %c0_i32_0 = arith.constant 0 : i32
    return %arg0, %c0_i32, %arg1 : i32, i32, i32
  }
}

</mosaic_0001>

<bundles_post_ra>
// kernel: _lambda_.1
= control target key start
LH: loop header
LB: loop body
LE: loop exit
PB: predicated region body
PF: predicated region fallthrough
CT: control target
= control target key end

     0   :  { %s474_s12 = smov 0   ;;  %s476_s13 = smov 0   ;;  %s531_s0 = inlined_call_operand.vmem [shape: f32[2,8,256], index: 0, kind: input, shape index: {}]   ;;  %s532_s1 = inlined_call_operand.vmem [shape: bf16[4,8], index: 1, kind: input, shape index: {}]   ;;  %s533_s2 = inlined_call_operand.vmem [shape: f32[4,1], index: 2, kind: input, shape index: {}]   ;;  %s534_s3 = inlined_call_operand.vmem [shape: f32[2,4,256], index: 3, kind: output, shape index: {}]  }
   0x1   :  { %s478_s14 = smov 0   ;;  %s480_s15 = smov 0  }
   0x2   :  { %s482_s16 = smov 0  }
   0x3 LB: > { %s22_s17 = sadd.s32 1, %s441_s14  ;;  %s25_s18 = sadd.s32 1, %s445_s15  ;;  %s449_s16 = sphi %s482_s16, %s13_s16   ;;  %s445_s15 = sphi %s480_s15, %s538_s15   ;;  %s441_s14 = sphi %s478_s14, %s537_s14   ;;  %s437_s13 = sphi %s476_s13, %s536_s13   ;;  %s433_s12 = sphi %s474_s12, %s535_s12  }
   0x4   : > { %p23_p0 = scmp.ge.s32.totalorder %s22_s17, 2  ;;  %p351_p1 = scmp.ge.s32.totalorder %s449_s16, 1 }
   0x5   : > { %p156_p2 = scmp.lt.s32.totalorder %s449_s16, 5 }
   0x6   : > { %s540_s17 = smov (%p23_p0, %s22_s17), 0  ;;  %s542_s18 = smov (!%p23_p0, %s25_s18), %s445_s15 }
   0x7   : > { %p157_p3 = pnand %p351_p1, %p156_p2  ;;  %p27_p4 = scmp.ge.s32.totalorder %s542_s18, 2 }
   0x8   : > { %p186_p5 = scmp.lt.s32.totalorder (!%p157_p3), %s437_s13, 1  ;;  %p188_p6 = scmp.lt.s32.totalorder (!%p157_p3), %s433_s12, 1  ;;  %v451_v0 = vmov (!%p157_p3), 0.0   ;;  %vm452_vm0 = vmmov (!%p157_p3), 0   ;;  %v206_v1 = vld [vmem:[%s533_s2] sm:$0xf] (!%p157_p3) }
   0x9   : > { %s544_s18 = smov (%p27_p4, %s542_s18), 0  ;;  %160 = sbr.rel (%p157_p3) target bundleno = 243 (0xf3), region = 32 }
   0xa   : > { %361 = vmatprep.subr.bf16.mxu0 (!%p157_p3), %v451_v0  ;;  %363 = vmatprep.mubr.msk.bf16.mxu0 (!%p157_p3), %vm452_vm0, %v451_v0  ;;  %v453_v2 = vmov (!%p157_p3), 0   ;;  %vm216_vm1 = vcmask (!%p157_p3), 1043456   ;;  %v205_v6 = vld [vmem:[%s532_s1] sm:$0x3] (!%p157_p3)  ;;  %vm212_vm2 = vcmask (!%p157_p3), 64512  }
   0xb   : > { %410 = vset.pattern.permute.xlu0 (!%p157_p3), %v453_v2 }
   0xc   : > { %209 = vperm.xlu0 (!%p157_p3), %410, %v206_v1  }
  0x10   : > { %s546_s13 = smov (!%p186_p5, %s437_s13), 1  ;;  %s548_s12 = smov (!%p188_p6, %s433_s12), 1 }
  0x11   : > { %s352_s21 = sshll.u32 %s546_s13, 1 }
  0x12   : > { %s191_s22 = sadd.s32 %s352_s21, %s548_s12 }
  0x13   : > { %s353_s23 = sshll.u32 %s191_s22, 3  ;;  %s355_s29 = sshll.u32 %s191_s22, 2 }
  0x14   : > { %s193_s26 = scalar_lea.vmem %s531_s0, %s353_s23  ;;  %s201_s5 = scalar_lea.vmem %s534_s3, %s355_s29 }
  0x15   : > { %v203_v3 = vld [vmem:[%s193_s26] sm:$0xff] }
  0x16   : > { %v204_v4 = vpack.c.bf16 %v203_v3, %v203_v3 }
  0x18   : > { %v218_v5 = vsel %vm216_vm1, %v204_v4, 0 }
  0x19   : > { %362 = vmatpush3.bf16.msra.mxu0 %v218_v5 }
  0x1c   : > { %364 = vmatmul.mubr.msk.bf16.vlgmr.msra.gmra.mrb[0].mxu0 %vm212_vm2, %v205_v6 }
  0x8b   : > { %v210_v7 = vpop.permute.xlu0 %209 }
  0xef   : > { %v254_v8 = vpop.f32.mrb[0].mxu0 }
  0xf0   : > { %v255_v9 = vadd.f32 %v254_v8, %v210_v7  ;;  %v365_v10 = vpop.f32.mrb[1].mxu0 }
  0xf1   : > { %v257_v11 = vpop.f32.mrb[2].mxu0 }
  0xf2   : > { %260 = vst [vmem:[%s201_s5] sm:$0xf] %v255_v9  ;;  %v366_v12 = vpop.f32.mrb[3].mxu0 }
  0xf3 PF: > { %s13_s16 = sadd.s32 1, %s449_s16   ;;  %s535_s12 = smov %s441_s14 }
  0xf4   : > { %p10_p7 = scmp.ge.s32.totalorder %s13_s16, 6   ;;  %s536_s13 = smov %s445_s15 }
  0xf5   : > { %s537_s14 = smov %s540_s17  ;;  %s538_s15 = smov %s544_s18 }
  0xf6   :  { %12 = sbr.rel (!%p10_p7) target bundleno = 3 (0x3), region = 62 }

</bundles_post_ra>
